<compile_context>
chip_gen: v7x
topology: tpu7x:2x2x1
jax: 0.10.0
libtpu: 0.0.40
codegen_flags: <defaults>
</compile_context>

<pallas_src>
import jax
import jax.numpy as jnp
from jax.experimental import pallas as pl
from jax.experimental.pallas import tpu as pltpu


def _round_up(x, m):
    return ((x + m - 1) // m) * m


def _swiglu_kernel(x_ref, wg_ref, wv_ref, bg_ref, bv_ref, o_ref,
                   accg_ref, accv_ref):
    # x_ref:  (tm, tk)   token tile
    # wg_ref: (tk, tn)   gate-weight tile
    # wv_ref: (tk, tn)   value-weight tile
    # bg_ref: (1, tn)    gate bias (f32)
    # bv_ref: (1, tn)    value bias (f32)
    # o_ref:  (tm, tn)   output tile
    # accg_ref / accv_ref: (tm, tn) f32 accumulators (persist across K steps)
    k = pl.program_id(2)

    @pl.when(k == 0)
    def _():
        accg_ref[...] = jnp.zeros_like(accg_ref)
        accv_ref[...] = jnp.zeros_like(accv_ref)

    x = x_ref[...]
    accg_ref[...] += jnp.dot(x, wg_ref[...], preferred_element_type=jnp.float32)
    accv_ref[...] += jnp.dot(x, wv_ref[...], preferred_element_type=jnp.float32)

    @pl.when(k == pl.num_programs(2) - 1)
    def _():
        g = accg_ref[...] + bg_ref[...]
        v = accv_ref[...] + bv_ref[...]
        # SiLU(g) * v in f32; sigmoid lowers to the EUP slot (free under MXU work).
        o_ref[...] = (g * jax.nn.sigmoid(g) * v).astype(o_ref.dtype)


def swiglu_pallas(x, wg, wv, bg, bv, *, tm=256, tn=256, tk=None, mxu_dtype=None):
    """x: (batch, seq, dim_in) -> (batch, seq, dim_out).

    mxu_dtype: optional compute dtype for the matmul operands (e.g.
    jnp.bfloat16). Accumulation, bias add and SiLU stay in f32; output keeps
    the original input dtype.
    """
    batch, seq, dim_in = x.shape
    dim_out = wg.shape[1]
    out_dtype = x.dtype
    M = batch * seq

    if mxu_dtype is not None:
        x = x.astype(mxu_dtype)
        wg = wg.astype(mxu_dtype)
        wv = wv.astype(mxu_dtype)
    bg = bg.astype(jnp.float32)
    bv = bv.astype(jnp.float32)

    # ---- tile selection -------------------------------------------------
    # Sublane granule on the token axis: 8 for 32-bit, 16 for 16-bit packing.
    m_granule = 16 if jnp.dtype(x.dtype).itemsize < 4 else 8
    tm = max(m_granule, min(tm, _round_up(M, m_granule)))
    tm = _round_up(tm, m_granule)
    # Lane-dense output tiles: tn a multiple of 128 (pad dim_out if needed).
    tn = _round_up(min(tn, _round_up(dim_out, 128)), 128)
    # K tiling only when dim_in is large; otherwise one K step so each weight
    # tile is fetched exactly once (weights depend only on the outer N axis).
    if tk is None:
        tk = _round_up(dim_in, 128)
        if tk > 2048:
            tk = 1024
    tk = _round_up(tk, 128)

    M_pad = _round_up(M, tm)
    N_pad = _round_up(dim_out, tn)
    K_pad = _round_up(dim_in, tk)

    # ---- zero-pad operands (zeros leave the math unchanged) --------------
    x_flat = x.reshape(M, dim_in)
    x_p = jnp.zeros((M_pad, K_pad), x.dtype).at[:M, :dim_in].set(x_flat)
    wg_p = jnp.zeros((K_pad, N_pad), wg.dtype).at[:dim_in, :dim_out].set(wg)
    wv_p = jnp.zeros((K_pad, N_pad), wv.dtype).at[:dim_in, :dim_out].set(wv)
    bg_p = jnp.zeros((1, N_pad), jnp.float32).at[0, :dim_out].set(bg)
    bv_p = jnp.zeros((1, N_pad), jnp.float32).at[0, :dim_out].set(bv)

    nj = N_pad // tn
    ni = M_pad // tm
    nk = K_pad // tk

    # ---- explicit VMEM budget (v7x has only 64 MiB physical) -------------
    xb = jnp.dtype(x.dtype).itemsize
    wb = jnp.dtype(wg.dtype).itemsize
    ob = jnp.dtype(out_dtype).itemsize
    per_buf = (tm * tk * xb + 2 * tk * tn * wb + 2 * tn * 4 + tm * tn * ob)
    est = 2 * per_buf + 2 * tm * tn * 4            # double-buffering + f32 scratch
    vmem_limit = min(64 * 1024 * 1024, max(32 * 1024 * 1024, int(1.5 * est)))

    # TODO(synk): if profiling shows exposed weight DMA, bump the weight
    # BlockSpecs to pipeline_mode=pl.Buffered(3) (only with VMEM headroom).
    out_p = pl.pallas_call(
        _swiglu_kernel,
        out_shape=jax.ShapeDtypeStruct((M_pad, N_pad), out_dtype),
        grid_spec=pltpu.PrefetchScalarGridSpec(
            num_scalar_prefetch=0,
            grid=(nj, ni, nk),                     # N outer, M inner, K last
            in_specs=[
                pl.BlockSpec((tm, tk), lambda j, i, k: (i, k)),   # x
                pl.BlockSpec((tk, tn), lambda j, i, k: (k, j)),   # Wg
                pl.BlockSpec((tk, tn), lambda j, i, k: (k, j)),   # Wv
                pl.BlockSpec((1, tn), lambda j, i, k: (0, j)),    # bg
                pl.BlockSpec((1, tn), lambda j, i, k: (0, j)),    # bv
            ],
            out_specs=pl.BlockSpec((tm, tn), lambda j, i, k: (i, j)),
            scratch_shapes=[
                pltpu.VMEM((tm, tn), jnp.float32),   # gate accumulator
                pltpu.VMEM((tm, tn), jnp.float32),   # value accumulator
            ],
        ),
        compiler_params=pltpu.CompilerParams(
            dimension_semantics=("parallel", "parallel", "arbitrary"),
            vmem_limit_bytes=vmem_limit,
        ),
    )(x_p, wg_p, wv_p, bg_p, bv_p)

    return out_p[:M, :dim_out].reshape(batch, seq, dim_out)


def init_swiglu_params(key, dim_in, dim_out, dtype=jnp.float32):
    """Deterministic init mimicking nn.Linear(dim_in, 2*dim_out)."""
    kw, kb = jax.random.split(key)
    bound = 1.0 / (dim_in ** 0.5)
    # PyTorch stores weight as (2*dim_out, dim_in); we keep the transposed view.
    w_full = jax.random.uniform(kw, (2 * dim_out, dim_in), dtype,
                                minval=-bound, maxval=bound)
    b_full = jax.random.uniform(kb, (2 * dim_out,), dtype,
                                minval=-bound, maxval=bound)
    wg = w_full[:dim_out].T          # (dim_in, dim_out)  -> gate half
    wv = w_full[dim_out:].T          # (dim_in, dim_out)  -> value half
    bg = b_full[:dim_out]
    bv = b_full[dim_out:]
    return wg, wv, bg, bv


def swiglu_reference(x, wg, wv, bg, bv):
    g = jnp.dot(x, wg) + bg
    v = jnp.dot(x, wv) + bv
    return jax.nn.silu(g) * v


if __name__ == "__main__":
    batch, seq, dim_in, dim_out = 2, 8, 32, 32
    key = jax.random.PRNGKey(0)
    kx, kp = jax.random.split(key)

    x = jax.random.normal(kx, (batch, seq, dim_in), jnp.float32)
    wg, wv, bg, bv = init_swiglu_params(kp, dim_in, dim_out)

    ref = swiglu_reference(x, wg, wv, bg, bv)

    # f32 operand path (exact vs. reference).
    out = swiglu_pallas(x, wg, wv, bg, bv)
    out = jax.block_until_ready(out)
    assert out.shape == (batch, seq, dim_out)
    assert jnp.allclose(out, ref, atol=1e-5, rtol=1e-5)

    # bf16 MXU-operand path (production config), f32 accumulate — loose tol.
    out_bf16 = swiglu_pallas(x, wg, wv, bg, bv, mxu_dtype=jnp.bfloat16)
    out_bf16 = jax.block_until_ready(out_bf16)
    assert jnp.allclose(out_bf16, ref, atol=5e-2, rtol=5e-2)

    print("KERNEL_OK")
</pallas_src>

<mosaic_0001>
module attributes {stable_mosaic.version = 11 : i64} {
  func.func @_swiglu_kernel(%arg0: i32, %arg1: i32, %arg2: i32, %arg3: memref<16x128xf32, #tpu.memory_space<vmem>>, %arg4: memref<128x128xf32, #tpu.memory_space<vmem>>, %arg5: memref<128x128xf32, #tpu.memory_space<vmem>>, %arg6: memref<1x128xf32, #tpu.memory_space<vmem>>, %arg7: memref<1x128xf32, #tpu.memory_space<vmem>>, %arg8: memref<16x128xf32, #tpu.memory_space<vmem>>, %arg9: memref<16x128xf32, #tpu.memory_space<vmem>>, %arg10: memref<16x128xf32, #tpu.memory_space<vmem>>) attributes {dimension_semantics = [#tpu.dimension_semantics<parallel>, #tpu.dimension_semantics<parallel>, #tpu.dimension_semantics<arbitrary>], iteration_bounds = array<i64: 1, 1, 1>, scalar_prefetch = 0 : i64, scratch_operands = 2 : i64, tpu.core_type = #tpu.core_type<tc>, window_params = [{transform_indices = @transform_0, window_bounds = array<i64: 16, 128>}, {transform_indices = @transform_1, window_bounds = array<i64: 128, 128>}, {transform_indices = @transform_2, window_bounds = array<i64: 128, 128>}, {transform_indices = @transform_3, window_bounds = array<i64: 1, 128>}, {transform_indices = @transform_4, window_bounds = array<i64: 1, 128>}, {transform_indices = @transform_5, window_bounds = array<i64: 16, 128>}]} {
    %c0_i32 = arith.constant 0 : i32
    %0 = arith.cmpi eq, %arg2, %c0_i32 : i32
    %1 = arith.extui %0 : i1 to i32
    %c0_i32_0 = arith.constant 0 : i32
    %2 = arith.cmpi ne, %1, %c0_i32_0 : i32
    scf.if %2 {
      %cst_17 = arith.constant 0.000000e+00 : f32
      %17 = vector.broadcast %cst_17 : f32 to vector<16x128xf32>
      %c0_18 = arith.constant 0 : index
      %c0_19 = arith.constant 0 : index
      %18 = vector.load %arg9[%c0_18, %c0_19] : memref<16x128xf32, #tpu.memory_space<vmem>>, vector<16x128xf32>
      tpu.vector_store %arg9[%c0_18, %c0_19], %17 {strides = array<i32>} : memref<16x128xf32, #tpu.memory_space<vmem>>, vector<16x128xf32>,
      %cst_20 = arith.constant 0.000000e+00 : f32
      %19 = vector.broadcast %cst_20 : f32 to vector<16x128xf32>
      %c0_21 = arith.constant 0 : index
      %c0_22 = arith.constant 0 : index
      %20 = vector.load %arg10[%c0_21, %c0_22] : memref<16x128xf32, #tpu.memory_space<vmem>>, vector<16x128xf32>
      tpu.vector_store %arg10[%c0_21, %c0_22], %19 {strides = array<i32>} : memref<16x128xf32, #tpu.memory_space<vmem>>, vector<16x128xf32>,
    } else {
    }
    %c0 = arith.constant 0 : index
    %c0_1 = arith.constant 0 : index
    %3 = vector.load %arg3[%c0, %c0_1] : memref<16x128xf32, #tpu.memory_space<vmem>>, vector<16x128xf32>
    %c0_2 = arith.constant 0 : index
    %c0_3 = arith.constant 0 : index
    %4 = vector.load %arg9[%c0_2, %c0_3] : memref<16x128xf32, #tpu.memory_space<vmem>>, vector<16x128xf32>
    %c0_4 = arith.constant 0 : index
    %c0_5 = arith.constant 0 : index
    %5 = vector.load %arg4[%c0_4, %c0_5] : memref<128x128xf32, #tpu.memory_space<vmem>>, vector<128x128xf32>
    %cst = arith.constant dense<0.000000e+00> : vector<16x128xf32>
    %6 = tpu.matmul %3, %5, %cst {dimension_numbers = #tpu.dot_dimension_numbers<[1], [0], [0], [1], [0, 0, 1, 1], [], []>} : vector<16x128xf32>, vector<128x128xf32>, vector<16x128xf32> -> vector<16x128xf32>
    %7 = arith.addf %4, %6 : vector<16x128xf32>
    %c0_6 = arith.constant 0 : index
    %c0_7 = arith.constant 0 : index
    %8 = vector.load %arg9[%c0_6, %c0_7] : memref<16x128xf32, #tpu.memory_space<vmem>>, vector<16x128xf32>
    tpu.vector_store %arg9[%c0_6, %c0_7], %7 {strides = array<i32>} : memref<16x128xf32, #tpu.memory_space<vmem>>, vector<16x128xf32>,
    %c0_8 = arith.constant 0 : index
    %c0_9 = arith.constant 0 : index
    %9 = vector.load %arg10[%c0_8, %c0_9] : memref<16x128xf32, #tpu.memory_space<vmem>>, vector<16x128xf32>
    %c0_10 = arith.constant 0 : index
    %c0_11 = arith.constant 0 : index
    %10 = vector.load %arg5[%c0_10, %c0_11] : memref<128x128xf32, #tpu.memory_space<vmem>>, vector<128x128xf32>
    %cst_12 = arith.constant dense<0.000000e+00> : vector<16x128xf32>
    %11 = tpu.matmul %3, %10, %cst_12 {dimension_numbers = #tpu.dot_dimension_numbers<[1], [0], [0], [1], [0, 0, 1, 1], [], []>} : vector<16x128xf32>, vector<128x128xf32>, vector<16x128xf32> -> vector<16x128xf32>
    %12 = arith.addf %9, %11 : vector<16x128xf32>
    %c0_13 = arith.constant 0 : index
    %c0_14 = arith.constant 0 : index
    %13 = vector.load %arg10[%c0_13, %c0_14] : memref<16x128xf32, #tpu.memory_space<vmem>>, vector<16x128xf32>
    tpu.vector_store %arg10[%c0_13, %c0_14], %12 {strides = array<i32>} : memref<16x128xf32, #tpu.memory_space<vmem>>, vector<16x128xf32>,
    %c0_i32_15 = arith.constant 0 : i32
    %14 = arith.cmpi eq, %arg2, %c0_i32_15 : i32
    %15 = arith.extui %14 : i1 to i32
    %c0_i32_16 = arith.constant 0 : i32
    %16 = arith.cmpi ne, %15, %c0_i32_16 : i32
    scf.if %16 {
      %c0_17 = arith.constant 0 : index
      %c0_18 = arith.constant 0 : index
      %17 = vector.load %arg9[%c0_17, %c0_18] : memref<16x128xf32, #tpu.memory_space<vmem>>, vector<16x128xf32>
      %c0_19 = arith.constant 0 : index
      %c0_20 = arith.constant 0 : index
      %18 = vector.load %arg6[%c0_19, %c0_20] : memref<1x128xf32, #tpu.memory_space<vmem>>, vector<1x128xf32>
      %19 = vector.broadcast %18 : vector<1x128xf32> to vector<16x128xf32>
      %20 = arith.addf %17, %19 : vector<16x128xf32>
      %c0_21 = arith.constant 0 : index
      %c0_22 = arith.constant 0 : index
      %21 = vector.load %arg10[%c0_21, %c0_22] : memref<16x128xf32, #tpu.memory_space<vmem>>, vector<16x128xf32>
      %c0_23 = arith.constant 0 : index
      %c0_24 = arith.constant 0 : index
      %22 = vector.load %arg7[%c0_23, %c0_24] : memref<1x128xf32, #tpu.memory_space<vmem>>, vector<1x128xf32>
      %23 = vector.broadcast %22 : vector<1x128xf32> to vector<16x128xf32>
      %24 = arith.addf %21, %23 : vector<16x128xf32>
      %25 = arith.negf %20 : vector<16x128xf32>
      %26 = math.exp %25 : vector<16x128xf32>
      %cst_25 = arith.constant 1.000000e+00 : f32
      %27 = vector.broadcast %cst_25 : f32 to vector<16x128xf32>
      %28 = arith.addf %27, %26 : vector<16x128xf32>
      %29 = arith.divf %27, %28 : vector<16x128xf32>
      %30 = arith.mulf %20, %29 : vector<16x128xf32>
      %31 = arith.mulf %30, %24 : vector<16x128xf32>
      %c0_26 = arith.constant 0 : index
      %c0_27 = arith.constant 0 : index
      %32 = vector.load %arg8[%c0_26, %c0_27] : memref<16x128xf32, #tpu.memory_space<vmem>>, vector<16x128xf32>
      tpu.vector_store %arg8[%c0_26, %c0_27], %31 {strides = array<i32>} : memref<16x128xf32, #tpu.memory_space<vmem>>, vector<16x128xf32>,
    } else {
    }
    return
  }
  func.func @transform_0(%arg0: i32, %arg1: i32, %arg2: i32) -> (i32, i32) {
    %c0_i32 = arith.constant 0 : i32
    return %arg1, %arg2 : i32, i32
  }
  func.func @transform_1(%arg0: i32, %arg1: i32, %arg2: i32) -> (i32, i32) {
    %c0_i32 = arith.constant 0 : i32
    return %arg2, %arg0 : i32, i32
  }
  func.func @transform_2(%arg0: i32, %arg1: i32, %arg2: i32) -> (i32, i32) {
    %c0_i32 = arith.constant 0 : i32
    return %arg2, %arg0 : i32, i32
  }
  func.func @transform_3(%arg0: i32, %arg1: i32, %arg2: i32) -> (i32, i32) {
    %c0_i32 = arith.constant 0 : i32
    %c0_i32_0 = arith.constant 0 : i32
    return %c0_i32, %arg0 : i32, i32
  }
  func.func @transform_4(%arg0: i32, %arg1: i32, %arg2: i32) -> (i32, i32) {
    %c0_i32 = arith.constant 0 : i32
    %c0_i32_0 = arith.constant 0 : i32
    return %c0_i32, %arg0 : i32, i32
  }
  func.func @transform_5(%arg0: i32, %arg1: i32, %arg2: i32) -> (i32, i32) {
    %c0_i32 = arith.constant 0 : i32
    return %arg1, %arg0 : i32, i32
  }
}

</mosaic_0001>

<bundles_post_ra>
// kernel: tpu_custom_call.1
= control target key start
LH: loop header
LB: loop body
LE: loop exit
PB: predicated region body
PF: predicated region fallthrough
CT: control target
= control target key end

     0   :  { %10 = vsyncpa [#allocation5], 0  ;;  %s718_s0 = inlined_call_operand.hbm [shape: f32[16,128], index: 0, kind: input, shape index: {}]   ;;  %s719_s1 = inlined_call_operand.hbm [shape: f32[128,128], index: 1, kind: input, shape index: {}]   ;;  %s720_s2 = inlined_call_operand.hbm [shape: f32[128,128], index: 2, kind: input, shape index: {}]   ;;  %s721_s3 = inlined_call_operand.vmem [shape: f32[1,128], index: 3, kind: input, shape index: {}]   ;;  %s722_s4 = inlined_call_operand.vmem [shape: f32[1,128], index: 4, kind: input, shape index: {}]   ;;  %s723_s5 = inlined_call_operand.hbm [shape: f32[16,128], index: 5, kind: output, shape index: {}]  }
   0x1   :  { %11 = vsyncpa [#allocation8], 0 }
   0x2   :  { %12 = vsyncpa [#allocation6], 0  ;;  %s609_s18 = smov [#allocation7]   ;;  %s610_s20 = smov [#allocation4]  }
   0x3   :  { %s30_s19 = sshll.u32 %s609_s18, 4  ;;  %s18_s21 = sshll.u32 %s610_s20, 4  ;;  %s31_s19 = int_to_ptr.vmem [resolvable:$true] %s30_s19  ;;  %s645_s21 = int_to_ptr.vmem [resolvable:$true] %s18_s21 }
   0x4   :  { %s515_s24 = scalar_lea.hbm %s719_s1, 2048 }
   0x5   :  { %p516_p0 = scmp.ne.s32.totalorder %s719_s1, %s515_s24  ;;  %p519_p1 = scmp.lt.u32.totalorder %s515_s24, %s719_s1 }
   0x7   :  { %p521_p2 = pnand %p519_p1, %p516_p0 }
   0x9   :  { %524 = shalt.err (!%p521_p2)
}
   0xa   :  { %s525_s29 = scalar_lea.vmem %s31_s19, 2048  ;;  %p530_p4 = scmp.lt.s32.totalorder %s31_s19, %s31_s19 }
   0xb   :  { %p526_p3 = scmp.ne.s32.totalorder %s31_s19, %s525_s29  ;;  %p531_p5 = scmp.lt.s32.totalorder %s525_s29, %s525_s29 }
   0xd   :  { %p532_p6 = por %p531_p5, %p530_p4 }
   0xf   :  { %p533_p7 = pnand %p532_p6, %p526_p3 }
  0x11   :  { %536 = shalt.err (!%p533_p7)
}
  0x12   :  { %s611_s30 = smov 128   ;;  %s612_s6 = smov 8  }
  0x13   :  { %36 = dma.hbm_to_vmem [thread:$0]  %s719_s1, 2048, %s31_s19, [#allocation8], %s611_s30, %s611_s30, %s612_s6  }
  0x14   :  { %s537_s11 = scalar_lea.hbm %s718_s0, 256 }
  0x15   :  { %p538_p8 = scmp.ne.s32.totalorder %s718_s0, %s537_s11  ;;  %p541_p9 = scmp.lt.u32.totalorder %s537_s11, %s718_s0 }
  0x17   :  { %p543_p10 = pnand %p541_p9, %p538_p8 }
  0x19   :  { %546 = shalt.err (!%p543_p10)
}
  0x1a   :  { %s547_s16 = scalar_lea.vmem %s645_s21, 256  ;;  %p552_p12 = scmp.lt.s32.totalorder %s645_s21, %s645_s21 }
  0x1b   :  { %p548_p11 = scmp.ne.s32.totalorder %s645_s21, %s547_s16  ;;  %p553_p13 = scmp.lt.s32.totalorder %s547_s16, %s547_s16 }
  0x1d   :  { %p554_p0 = por %p553_p13, %p552_p12 }
  0x1f   :  { %p555_p1 = pnand %p554_p0, %p548_p11 }
  0x21   :  { %558 = shalt.err (!%p555_p1)
}
  0x22   :  { %24 = dma.hbm_to_vmem [thread:$0]  %s718_s0, 256, %s645_s21, [#allocation5], %s611_s30, %s611_s30, %s612_s6  }
  0x23   :  { %s613_s18 = smov [#allocation9]   ;;  %s559_s23 = scalar_lea.hbm %s720_s2, 2048 }
  0x24   :  { %s42_s19 = sshll.u32 %s613_s18, 4  ;;  %p560_p2 = scmp.ne.s32.totalorder %s720_s2, %s559_s23  ;;  %s43_s19 = int_to_ptr.vmem [resolvable:$true] %s42_s19 }
  0x25   :  { %p563_p3 = scmp.lt.u32.totalorder %s559_s23, %s720_s2 }
  0x27   :  { %p565_p4 = pnand %p563_p3, %p560_p2 }
  0x29   :  { %568 = shalt.err (!%p565_p4)
}
  0x2a   :  { %s569_s28 = scalar_lea.vmem %s43_s19, 2048  ;;  %p574_p6 = scmp.lt.s32.totalorder %s43_s19, %s43_s19 }
  0x2b   :  { %p570_p5 = scmp.ne.s32.totalorder %s43_s19, %s569_s28  ;;  %p575_p7 = scmp.lt.s32.totalorder %s569_s28, %s569_s28 }
  0x2d   :  { %p576_p8 = por %p575_p7, %p574_p6 }
  0x2f   :  { %p577_p9 = pnand %p576_p8, %p570_p5 }
  0x31   :  { %580 = shalt.err (!%p577_p9)
}
  0x32   :  { %48 = dma.hbm_to_vmem [thread:$0]  %s720_s2, 2048, %s43_s19, [#allocation8], %s611_s30, %s611_s30, %s612_s6  }
  0x33   :  { %603 = dma.done.wait [#allocation5], 256  }
  0x34   :  { %604 = vsyncadd [#allocation5], 4294967040 }
  0x35   :  { %605 = dma.done.wait [#allocation8], 4096  }
  0x36   :  { %606 = vsyncadd [#allocation8], 4294963200  ;;  %v74_v0 = vld [vmem:[#allocation7] sm:$0xff]  ;;  %v75_v1 = vld [vmem:[#allocation7 + $0x8] sm:$0xff] }
  0x37   :  { %v76_v2 = vld [vmem:[#allocation7 + $0x10] sm:$0xff]  ;;  %v437_v3 = vpack.c.bf16 %v75_v1, %v74_v0  ;;  %v77_v4 = vld [vmem:[#allocation7 + $0x18] sm:$0xff]  ;;  %v78_v6 = vld [vmem:[#allocation7 + $0x20] sm:$0xff] }
  0x38   :  { %v441_v5 = vpack.c.bf16 %v77_v4, %v76_v2  ;;  %v79_v7 = vld [vmem:[#allocation7 + $0x28] sm:$0xff]  ;;  %v171_v8 = vld [vmem:[#allocation9] sm:$0xff]  ;;  %v80_v10 = vld [vmem:[#allocation7 + $0x30] sm:$0xff] }
  0x39   :  { %438 = vmatprep.subr.bf16.mxu0 %v437_v3  ;;  %v445_v9 = vpack.c.bf16 %v79_v7, %v78_v6  ;;  %v81_v11 = vld [vmem:[#allocation7 + $0x38] sm:$0xff]  ;;  %v172_v12 = vld [vmem:[#allocation9 + $0x8] sm:$0xff]  ;;  %v70_v14 = vld [vmem:[#allocation4] sm:$0xff] }
  0x3a   :  { %440 = vmatpush3.bf16.msra.mxu0 %v437_v3  ;;  %v469_v13 = vpack.c.bf16 %v172_v12, %v171_v8  ;;  %v173_v15 = vld [vmem:[#allocation9 + $0x10] sm:$0xff]  ;;  %v174_v16 = vld [vmem:[#allocation9 + $0x18] sm:$0xff]  ;;  %399 = vmatprep.mubr.f32.mxu0 %v70_v14  ;;  %v175_v18 = vld [vmem:[#allocation9 + $0x20] sm:$0xff]  ;;  %v449_v20 = vpack.c.bf16 %v81_v11, %v80_v10 }
  0x3b   :  { %442 = vmatprep.subr.bf16.mxu0 %v441_v5  ;;  %v473_v17 = vpack.c.bf16 %v174_v16, %v173_v15  ;;  %v176_v19 = vld [vmem:[#allocation9 + $0x28] sm:$0xff]  ;;  %434 = vmatprep.mubr.f32.mxu1 %v70_v14  ;;  %v82_v21 = vld [vmem:[#allocation7 + $0x40] sm:$0xff]  ;;  %v177_v24 = vld [vmem:[#allocation9 + $0x30] sm:$0xff] }
  0x3c   :  { %470 = vmatprep.subr.bf16.mxu1 %v469_v13  ;;  %v83_v22 = vld [vmem:[#allocation7 + $0x48] sm:$0xff]  ;;  %v477_v23 = vpack.c.bf16 %v176_v19, %v175_v18  ;;  %v178_v25 = vld [vmem:[#allocation9 + $0x38] sm:$0xff]  ;;  %v84_v27 = vld [vmem:[#allocation7 + $0x50] sm:$0xff] }
  0x3d   :  { %472 = vmatpush3.bf16.msra.mxu1 %v469_v13  ;;  %v453_v26 = vpack.c.bf16 %v83_v22, %v82_v21  ;;  %v85_v28 = vld [vmem:[#allocation7 + $0x58] sm:$0xff]  ;;  %v481_v29 = vpack.c.bf16 %v178_v25, %v177_v24  ;;  %v179_v30 = vld [vmem:[#allocation9 + $0x40] sm:$0xff]  ;;  %v180_v31 = vld [vmem:[#allocation9 + $0x48] sm:$0xff] }
  0x3e   :  { %444 = vmatpush3.bf16.msra.mxu0 %v441_v5  ;;  %474 = vmatprep.subr.bf16.mxu1 %v473_v17  ;;  %v457_v32 = vpack.c.bf16 %v85_v28, %v84_v27  ;;  %v86_v33 = vld [vmem:[#allocation7 + $0x60] sm:$0xff]  ;;  %v87_v34 = vld [vmem:[#allocation7 + $0x68] sm:$0xff]  ;;  %v485_v35 = vpack.c.bf16 %v180_v31, %v179_v30  ;;  %v181_v36 = vld [vmem:[#allocation9 + $0x50] sm:$0xff] }
  0x3f   :  { %446 = vmatprep.subr.bf16.mxu0 %v445_v9  ;;  %v182_v37 = vld [vmem:[#allocation9 + $0x58] sm:$0xff]  ;;  %v461_v38 = vpack.c.bf16 %v87_v34, %v86_v33  ;;  %v88_v39 = vld [vmem:[#allocation7 + $0x70] sm:$0xff]  ;;  %v183_v42 = vld [vmem:[#allocation9 + $0x60] sm:$0xff] }
  0x40   :  { %v89_v40 = vld [vmem:[#allocation7 + $0x78] sm:$0xff]  ;;  %v489_v41 = vpack.c.bf16 %v182_v37, %v181_v36  ;;  %v184_v43 = vld [vmem:[#allocation9 + $0x68] sm:$0xff]  ;;  %v185_v46 = vld [vmem:[#allocation9 + $0x70] sm:$0xff] }
  0x41   :  { %476 = vmatpush3.bf16.msra.mxu1 %v473_v17  ;;  %v465_v44 = vpack.c.bf16 %v89_v40, %v88_v39  ;;  %v493_v45 = vpack.c.bf16 %v184_v43, %v183_v42  ;;  %v186_v47 = vld [vmem:[#allocation9 + $0x78] sm:$0xff]  ;;  %v327_v50 = vld [vmem:[%s721_s3] ss:$0 sm:$0xff]  ;;  %s614_s3 = smov [#allocation10]  }
  0x42   :  { %448 = vmatpush3.bf16.msra.mxu0 %v445_v9  ;;  %478 = vmatprep.subr.bf16.mxu1 %v477_v23  ;;  %v497_v48 = vpack.c.bf16 %v186_v47, %v185_v46  ;;  %v71_v49 = vld [vmem:[#allocation4 + $0x8] sm:$0xff]  ;;  %v328_v63 = vld [vmem:[%s722_s4] ss:$0 sm:$0xff]  ;;  %s314_s9 = sshll.u32 %s614_s3, 4  ;;  %s315_s9 = int_to_ptr.vmem [resolvable:$true] %s314_s9 }
  0x43   :  { %450 = vmatprep.subr.bf16.mxu0 %v449_v20  ;;  %s581_s10 = scalar_lea.vmem %s315_s9, 256  ;;  %p586_p11 = scmp.lt.s32.totalorder %s315_s9, %s315_s9 }
  0x44   :  { %p582_p10 = scmp.ne.s32.totalorder %s315_s9, %s581_s10  ;;  %p587_p12 = scmp.lt.s32.totalorder %s581_s10, %s581_s10 }
  0x45   :  { %480 = vmatpush3.bf16.msra.mxu1 %v477_v23 }
  0x46   :  { %452 = vmatpush3.bf16.msra.mxu0 %v449_v20  ;;  %482 = vmatprep.subr.bf16.mxu1 %v481_v29  ;;  %p588_p13 = por %p587_p12, %p586_p11 }
  0x47   :  { %454 = vmatprep.subr.bf16.mxu0 %v453_v26 }
  0x48   :  { %p589_p0 = pnand %p588_p13, %p582_p10 }
  0x49   :  { %484 = vmatpush3.bf16.msra.mxu1 %v481_v29 }
  0x4a   :  { %456 = vmatpush3.bf16.msra.mxu0 %v453_v26  ;;  %486 = vmatprep.subr.bf16.mxu1 %v485_v35 }
  0x4b   :  { %458 = vmatprep.subr.bf16.mxu0 %v457_v32 }
  0x4d   :  { %488 = vmatpush3.bf16.msra.mxu1 %v485_v35 }
  0x4e   :  { %460 = vmatpush3.bf16.msra.mxu0 %v457_v32  ;;  %490 = vmatprep.subr.bf16.mxu1 %v489_v41 }
  0x4f   :  { %462 = vmatprep.subr.bf16.mxu0 %v461_v38 }
  0x51   :  { %492 = vmatpush3.bf16.msra.mxu1 %v489_v41 }
  0x52   :  { %464 = vmatpush3.bf16.msra.mxu0 %v461_v38  ;;  %494 = vmatprep.subr.bf16.mxu1 %v493_v45 }
  0x53   :  { %466 = vmatprep.subr.bf16.mxu0 %v465_v44 }
  0x55   :  { %496 = vmatpush3.bf16.msra.mxu1 %v493_v45 }
  0x56   :  { %468 = vmatpush3.bf16.msra.mxu0 %v465_v44  ;;  %498 = vmatprep.subr.bf16.mxu1 %v497_v48 }
  0x59   :  { %400 = vmatmul.mubr.f32.vlgmr.msra.gmra.mrb[0].mxu0 %v71_v49  ;;  %500 = vmatpush3.bf16.msra.mxu1 %v497_v48 }
  0x5c   :  { %435 = vmatmul.mubr.f32.vlgmr.msra.gmra.mrb[0].mxu1 %v71_v49 }
 0x12c   :  { %v401_v51 = vpop.f32.mrb[0].mxu0 }
 0x12d   :  { %v279_v52 = vadd.f32 %v401_v51, %v327_v50  ;;  %v156_v53 = vpop.f32.mrb[1].mxu0 }
 0x12e   :  { %v278_v54 = vadd.f32 %v327_v50, %v156_v53 }
 0x12f   :  { %v330_v55 = vmul.f32 -1.442695, %v279_v52  ;;  %v436_v57 = vpop.f32.mrb[0].mxu1 }
 0x130   :  { %v329_v56 = vmul.f32 -1.442695, %v278_v54  ;;  %v253_v58 = vpop.f32.mrb[1].mxu1  ;;  %v290_v0 = vadd.f32 %v436_v57, %v328_v63 }
 0x131   :  { %507 = vpow2.f32 %v330_v55  ;;  %v289_v2 = vadd.f32 %v328_v63, %v253_v58 }
 0x132   :  { %509 = vpow2.f32 %v329_v56 }
 0x13b   :  { %v508_v59 = vpop.eup %507 }
 0x13c   :  { %v510_v60 = vpop.eup %509  ;;  %v298_v61 = vadd.f32 1.0, %v508_v59 }
 0x13d   :  { %v297_v62 = vadd.f32 1.0, %v510_v60 }
 0x13e   :  { %511 = vrcp.f32 %v298_v61 }
 0x13f   :  { %513 = vrcp.f32 %v297_v62 }
 0x148   :  { %v512_v1 = vpop.eup %511 }
 0x149   :  { %v514_v3 = vpop.eup %513  ;;  %v304_v4 = vmul.f32 %v512_v1, %v279_v52 }
 0x14a   :  { %v303_v5 = vmul.f32 %v514_v3, %v278_v54 }
 0x14b   :  { %v306_v6 = vmul.f32 %v304_v4, %v290_v0 }
 0x14c   :  { %v305_v7 = vmul.f32 %v303_v5, %v289_v2 }
 0x14d   :  { %308 = vst [vmem:[#allocation10 + $0x8] sm:$0xff] %v306_v6 }
 0x14e   :  { %307 = vst [vmem:[#allocation10] sm:$0xff] %v305_v7 }
 0x14f   :  { %592 = shalt.err (!%p589_p0)
}
 0x150   :  { %s593_s12 = scalar_lea.hbm %s723_s5, 256 }
 0x151   :  { %p594_p1 = scmp.ne.s32.totalorder %s723_s5, %s593_s12  ;;  %p597_p2 = scmp.lt.u32.totalorder %s593_s12, %s723_s5 }
 0x153   :  { %p599_p3 = pnand %p597_p2, %p594_p1 }
 0x155   :  { %602 = shalt.err (!%p599_p3)
}
 0x156   :  { %320 = dma.vmem_to_hbm [thread:$0]  %s315_s9, 256, %s723_s5, [#allocation6], %s611_s30, %s611_s30, %s612_s6  }
 0x157   :  { %607 = dma.done.wait [#allocation6], 256  }
 0x158   :  { %608 = vsyncadd [#allocation6], 4294967040 }
 0x159   :  { %324 = vsyncpa [#allocation5], 1 }
 0x15a   :  { %325 = vsyncpa [#allocation8], 1 }
 0x15b   :  { %326 = vsyncpa [#allocation6], 1 }

</bundles_post_ra>
